<compile_context>
chip_gen: v6e
topology: v6e:2x2x1
jax: 0.10.0
libtpu: 0.0.40
codegen_flags: <defaults>
</compile_context>

<pallas_src>
import functools

import jax
import jax.numpy as jnp
from jax import lax
from jax.experimental import pallas as pl
from jax.experimental.pallas import tpu as pltpu


_DEFAULT_TB = 2048                      # max batch-tile rows per grid step
_CHUNK = 256                            # rows per double-buffered gather chunk (HBM path)
_VMEM_TABLE_BUDGET = 4 * 1024 * 1024    # combined table bytes for the VMEM-resident path
_MAX_SEGMENT = 32768                    # rows per pallas_call (bounds SMEM index arrays)


def _round_up(x: int, m: int) -> int:
    return ((x + m - 1) // m) * m


def _pick_tile(batch: int, tb: int):
    """Pick (batch tile, gather chunk).  Tile is a multiple of 8, aims for >=2
    grid steps (v7x 2-TC split) while staying large to amortize per-step cost."""
    half = -(-batch // 2)                               # cdiv(batch, 2)
    tb_eff = max(8, min(tb, _round_up(half, 8)))
    if tb_eff > _CHUNK:
        tb_eff = _round_up(tb_eff, _CHUNK)
        chunk = _CHUNK
    else:
        chunk = tb_eff
    return tb_eff, chunk


def _sigmoid(x):
    # Exact sigmoid: exp runs on the EUP; keeps f32 parity with the reference.
    return 1.0 / (1.0 + jnp.exp(-x))


# --------------------------------------------------------------------------
# Fast path: both embedding tables resident in VMEM (small catalogs).
# --------------------------------------------------------------------------
def _gmf_vmem_kernel(uidx_ref, iidx_ref,      # SMEM scalar prefetch: (Bp,) int32
                     utab_ref, itab_ref,      # VMEM: full (num_users/items, F) tables
                     w_ref, b_ref,            # VMEM (1, F) f32, SMEM (1,) f32
                     o_ref,                   # VMEM out block: (TB, 1) f32
                     ubuf_ref, ibuf_ref):     # VMEM scratch: (TB, F)
    tb = ubuf_ref.shape[0]
    base = pl.program_id(0) * tb

    # Unrolled row gather: dynamic-slice loads from the resident tables.
    def gather_row(r, carry):
        u = uidx_ref[base + r]
        it = iidx_ref[base + r]
        ubuf_ref[pl.ds(r, 1), :] = utab_ref[pl.ds(u, 1), :]
        ibuf_ref[pl.ds(r, 1), :] = itab_ref[pl.ds(it, 1), :]
        return carry

    lax.fori_loop(0, tb, gather_row, None, unroll=8)

    u = ubuf_ref[...].astype(jnp.float32)                     # (TB, F)
    it = ibuf_ref[...].astype(jnp.float32)                    # (TB, F)
    w = w_ref[...].astype(jnp.float32)                        # (1, F)
    logits = jnp.sum(u * it * w, axis=-1, keepdims=True)      # (TB, 1) XLU lane reduce
    o_ref[...] = _sigmoid(logits + b_ref[0])


# --------------------------------------------------------------------------
# General path: tables in HBM, chunked double-buffered per-row DMA gather.
# --------------------------------------------------------------------------
def _gmf_hbm_kernel(uidx_ref, iidx_ref,       # SMEM scalar prefetch: (Bp,) int32
                    utab_ref, itab_ref,       # HBM (pl.ANY): (num_users/items, F)
                    w_ref, b_ref,             # VMEM (1, F) f32, SMEM (1,) f32
                    o_ref,                    # VMEM out block: (TB, 1) f32
                    ubuf_ref, ibuf_ref,       # VMEM scratch: (2, CH, F)
                    sem_ref):                 # DMA semaphores: (2, 2) [table, slot]
    tb = o_ref.shape[0]
    ch = ubuf_ref.shape[1]
    n_chunks = tb // ch                       # static (tb is a multiple of ch)
    base = pl.program_id(0) * tb

    w = w_ref[...].astype(jnp.float32)        # hoisted out of the chunk loop
    bias = b_ref[0]

    def issue(c, slot):
        """Start per-row gather DMAs for chunk c into buffer `slot` (unrolled)."""
        off = base + c * ch

        def row(r, carry):
            u = uidx_ref[off + r]
            it = iidx_ref[off + r]
            pltpu.make_async_copy(utab_ref.at[pl.ds(u, 1), :],
                                  ubuf_ref.at[slot, pl.ds(r, 1), :],
                                  sem_ref.at[0, slot]).start()
            pltpu.make_async_copy(itab_ref.at[pl.ds(it, 1), :],
                                  ibuf_ref.at[slot, pl.ds(r, 1), :],
                                  sem_ref.at[1, slot]).start()
            return carry

        lax.fori_loop(0, ch, row, None, unroll=8)

    def drain(slot):
        """Two bulk waits per chunk.  DMA semaphores count bytes, so a single
        descriptor sized to the whole (CH, F) chunk buffer balances the CH
        per-row copies issued above (replaces 2*CH serial per-row waits)."""
        pltpu.make_async_copy(ubuf_ref.at[slot], ubuf_ref.at[slot],
                              sem_ref.at[0, slot]).wait()
        pltpu.make_async_copy(ibuf_ref.at[slot], ibuf_ref.at[slot],
                              sem_ref.at[1, slot]).wait()

    issue(0, 0)
    # Chunk loop unrolled in Python (n_chunks <= TB/CH = 8 by construction):
    # static buffer slots and static output offsets.
    for c in range(n_chunks):
        slot = c & 1
        if c + 1 < n_chunks:
            issue(c + 1, 1 - slot)            # prefetch next chunk first ...
        drain(slot)                           # ... then wait for this one
        u = ubuf_ref[slot].astype(jnp.float32)                    # (CH, F)
        it = ibuf_ref[slot].astype(jnp.float32)
        logits = jnp.sum(u * it * w, axis=-1, keepdims=True) + bias
        o_ref[pl.ds(c * ch, ch), :] = _sigmoid(logits)


# --------------------------------------------------------------------------
# Host-side wrapper.
# --------------------------------------------------------------------------
def _gmf_segment(user_table, item_table, weight_row, bias, uidx, iidx,
                 tb, use_vmem_tables):
    batch = uidx.shape[0]
    feat = user_table.shape[1]
    tb_eff, chunk = _pick_tile(batch, tb)
    bp = _round_up(batch, tb_eff)
    uidx = jnp.pad(uidx, (0, bp - batch))     # pad with row 0 (always valid)
    iidx = jnp.pad(iidx, (0, bp - batch))
    grid = (bp // tb_eff,)

    common_specs = [
        pl.BlockSpec((1, feat), lambda i, *_: (0, 0)),             # Linear weight row
        pl.BlockSpec(memory_space=pltpu.MemorySpace.SMEM),         # Linear bias scalar
    ]
    out_spec = pl.BlockSpec((tb_eff, 1), lambda i, *_: (i, 0))

    if use_vmem_tables:
        kernel = _gmf_vmem_kernel
        table_specs = [
            pl.BlockSpec(user_table.shape, lambda i, *_: (0, 0)),  # resident in VMEM
            pl.BlockSpec(item_table.shape, lambda i, *_: (0, 0)),
        ]
        scratch = [
            pltpu.VMEM((tb_eff, feat), user_table.dtype),
            pltpu.VMEM((tb_eff, feat), item_table.dtype),
        ]
    else:
        kernel = _gmf_hbm_kernel
        table_specs = [
            pl.BlockSpec(memory_space=pl.ANY),                     # stay in HBM
            pl.BlockSpec(memory_space=pl.ANY),
        ]
        scratch = [
            pltpu.VMEM((2, chunk, feat), user_table.dtype),        # double-buffered chunks
            pltpu.VMEM((2, chunk, feat), item_table.dtype),
            pltpu.SemaphoreType.DMA((2, 2)),
        ]

    out = pl.pallas_call(
        kernel,
        out_shape=jax.ShapeDtypeStruct((bp, 1), jnp.float32),
        grid_spec=pltpu.PrefetchScalarGridSpec(
            num_scalar_prefetch=2,                  # user_idx, item_idx -> SMEM
            grid=grid,
            in_specs=table_specs + common_specs,
            out_specs=out_spec,
            scratch_shapes=scratch,
        ),
        compiler_params=pltpu.CompilerParams(
            dimension_semantics=("parallel",),      # batch tiles are independent
        ),
    )(uidx, iidx, user_table, item_table, weight_row, bias)
    return out[:batch]


@functools.partial(jax.jit, static_argnames=("tb", "use_vmem_tables"))
def gmf_forward(user_table, item_table, weight_row, bias, user_idx, item_idx,
                *, tb=_DEFAULT_TB, use_vmem_tables=None):
    """Fused GMF forward.

    user_table: (num_users, F), item_table: (num_items, F).
    weight_row: (1, F) f32 (nn.Linear(F,1).weight); bias: (1,) f32.
    user_idx / item_idx: (B,) integer indices.
    Returns: (B, 1) f32 ratings (sigmoid outputs).
    """
    batch = user_idx.shape[0]
    feat = user_table.shape[1]
    assert item_table.shape[1] == feat
    assert weight_row.shape == (1, feat)
    assert bias.shape == (1,)

    if use_vmem_tables is None:
        table_bytes = (user_table.size * user_table.dtype.itemsize
                       + item_table.size * item_table.dtype.itemsize)
        use_vmem_tables = table_bytes <= _VMEM_TABLE_BUDGET

    uidx = user_idx.astype(jnp.int32)
    iidx = item_idx.astype(jnp.int32)

    # Segment very large batches so the scalar-prefetched index vectors never
    # blow the SMEM budget (1-D SMEM arrays pad to next_pow2(4N) bytes).
    parts = []
    for s in range(0, batch, _MAX_SEGMENT):
        e = min(batch, s + _MAX_SEGMENT)
        parts.append(_gmf_segment(user_table, item_table, weight_row, bias,
                                  uidx[s:e], iidx[s:e], tb, use_vmem_tables))
    return parts[0] if len(parts) == 1 else jnp.concatenate(parts, axis=0)


def gmf_reference(user_table, item_table, weight_row, bias, user_idx, item_idx):
    u = jnp.take(user_table, user_idx, axis=0).astype(jnp.float32)
    it = jnp.take(item_table, item_idx, axis=0).astype(jnp.float32)
    logits = (u * it) @ weight_row.astype(jnp.float32).T + bias
    return jax.nn.sigmoid(logits)


if __name__ == "__main__":
    # Small deterministic configuration consistent with the module.
    num_users = 16
    num_items = 16
    factor_num = 32          # args.factor_num
    batch = 10               # not a multiple of 8 -> exercises the padding path

    key = jax.random.PRNGKey(0)
    k_u, k_i, k_w, k_b, k_uid, k_iid = jax.random.split(key, 6)

    # Deterministic synthetic parameters (stand-in for nn.Embedding / nn.Linear weights).
    embedding_user = jax.random.normal(k_u, (num_users, factor_num), jnp.float32)
    embedding_item = jax.random.normal(k_i, (num_items, factor_num), jnp.float32)
    weight_row = jax.random.normal(k_w, (1, factor_num), jnp.float32) * 0.1
    bias = jax.random.normal(k_b, (1,), jnp.float32) * 0.1

    user_indices = jax.random.randint(k_uid, (batch,), 0, num_users, dtype=jnp.int32)
    item_indices = jax.random.randint(k_iid, (batch,), 0, num_items, dtype=jnp.int32)

    expected = gmf_reference(embedding_user, embedding_item, weight_row, bias,
                             user_indices, item_indices)

    # 1) Natural path for this tiny catalog: tables resident in VMEM.
    rating = gmf_forward(embedding_user, embedding_item, weight_row, bias,
                         user_indices, item_indices)
    rating = jax.block_until_ready(rating)
    assert rating.shape == (batch, 1), rating.shape
    assert jnp.allclose(rating, expected, atol=1e-4, rtol=1e-4), (
        f"VMEM-path mismatch:\n{rating}\nvs\n{expected}")

    # 2) Also validate the general HBM DMA-gather path on the same problem.
    rating_hbm = gmf_forward(embedding_user, embedding_item, weight_row, bias,
                             user_indices, item_indices, use_vmem_tables=False)
    rating_hbm = jax.block_until_ready(rating_hbm)
    assert rating_hbm.shape == (batch, 1), rating_hbm.shape
    assert jnp.allclose(rating_hbm, expected, atol=1e-4, rtol=1e-4), (
        f"HBM-path mismatch:\n{rating_hbm}\nvs\n{expected}")

    print("KERNEL_OK")
</pallas_src>

<mosaic_0001>
module attributes {stable_mosaic.version = 11 : i64} {
  func.func @_gmf_vmem_kernel(%arg0: i32, %arg1: memref<16xi32, #tpu.memory_space<smem>>, %arg2: memref<16xi32, #tpu.memory_space<smem>>, %arg3: memref<16x32xf32, #tpu.memory_space<vmem>>, %arg4: memref<16x32xf32, #tpu.memory_space<vmem>>, %arg5: memref<1x32xf32, #tpu.memory_space<vmem>>, %arg6: memref<1xf32, #tpu.memory_space<smem>>, %arg7: memref<8x1xf32, #tpu.memory_space<vmem>>, %arg8: memref<8x32xf32, #tpu.memory_space<vmem>>, %arg9: memref<8x32xf32, #tpu.memory_space<vmem>>) attributes {dimension_semantics = [#tpu.dimension_semantics<parallel>], iteration_bounds = array<i64: 2>, scalar_prefetch = 2 : i64, scratch_operands = 2 : i64, tpu.core_type = #tpu.core_type<tc>, window_params = [{pipeline_mode = #tpu.pipeline_mode<synchronous>, transform_indices = @transform_0, window_bounds = array<i64: 16, 32>}, {pipeline_mode = #tpu.pipeline_mode<synchronous>, transform_indices = @transform_1, window_bounds = array<i64: 16, 32>}, {pipeline_mode = #tpu.pipeline_mode<synchronous>, transform_indices = @transform_2, window_bounds = array<i64: 1, 32>}, {transform_indices = @transform_3, window_bounds = array<i64: 1>}, {transform_indices = @transform_4, window_bounds = array<i64: 8, 1>}]} {
    %c8_i32 = arith.constant 8 : i32
    %0 = arith.muli %arg0, %c8_i32 : i32
    %c0_i32 = arith.constant 0 : i32
    %1 = arith.addi %0, %c0_i32 : i32
    %2 = arith.index_cast %1 : i32 to index
    %3 = memref.load %arg1[%2] : memref<16xi32, #tpu.memory_space<smem>>
    %4 = arith.addi %0, %c0_i32 : i32
    %5 = arith.index_cast %4 : i32 to index
    %6 = memref.load %arg2[%5] : memref<16xi32, #tpu.memory_space<smem>>
    %7 = arith.index_cast %3 : i32 to index
    %c0 = arith.constant 0 : index
    %8 = vector.load %arg3[%7, %c0] : memref<16x32xf32, #tpu.memory_space<vmem>>, vector<1x32xf32>
    %9 = arith.index_cast %c0_i32 : i32 to index
    %c0_0 = arith.constant 0 : index
    %10 = vector.load %arg8[%9, %c0_0] : memref<8x32xf32, #tpu.memory_space<vmem>>, vector<1x32xf32>
    tpu.vector_store %arg8[%9, %c0_0], %8 {strides = array<i32>} : memref<8x32xf32, #tpu.memory_space<vmem>>, vector<1x32xf32>,
    %11 = arith.index_cast %6 : i32 to index
    %c0_1 = arith.constant 0 : index
    %12 = vector.load %arg4[%11, %c0_1] : memref<16x32xf32, #tpu.memory_space<vmem>>, vector<1x32xf32>
    %13 = arith.index_cast %c0_i32 : i32 to index
    %c0_2 = arith.constant 0 : index
    %14 = vector.load %arg9[%13, %c0_2] : memref<8x32xf32, #tpu.memory_space<vmem>>, vector<1x32xf32>
    tpu.vector_store %arg9[%13, %c0_2], %12 {strides = array<i32>} : memref<8x32xf32, #tpu.memory_space<vmem>>, vector<1x32xf32>,
    %c1_i32 = arith.constant 1 : i32
    %15 = arith.addi %0, %c1_i32 : i32
    %16 = arith.index_cast %15 : i32 to index
    %17 = memref.load %arg1[%16] : memref<16xi32, #tpu.memory_space<smem>>
    %18 = arith.addi %0, %c1_i32 : i32
    %19 = arith.index_cast %18 : i32 to index
    %20 = memref.load %arg2[%19] : memref<16xi32, #tpu.memory_space<smem>>
    %21 = arith.index_cast %17 : i32 to index
    %c0_3 = arith.constant 0 : index
    %22 = vector.load %arg3[%21, %c0_3] : memref<16x32xf32, #tpu.memory_space<vmem>>, vector<1x32xf32>
    %23 = arith.index_cast %c1_i32 : i32 to index
    %c0_4 = arith.constant 0 : index
    %24 = vector.load %arg8[%23, %c0_4] : memref<8x32xf32, #tpu.memory_space<vmem>>, vector<1x32xf32>
    tpu.vector_store %arg8[%23, %c0_4], %22 {strides = array<i32>} : memref<8x32xf32, #tpu.memory_space<vmem>>, vector<1x32xf32>,
    %25 = arith.index_cast %20 : i32 to index
    %c0_5 = arith.constant 0 : index
    %26 = vector.load %arg4[%25, %c0_5] : memref<16x32xf32, #tpu.memory_space<vmem>>, vector<1x32xf32>
    %27 = arith.index_cast %c1_i32 : i32 to index
    %c0_6 = arith.constant 0 : index
    %28 = vector.load %arg9[%27, %c0_6] : memref<8x32xf32, #tpu.memory_space<vmem>>, vector<1x32xf32>
    tpu.vector_store %arg9[%27, %c0_6], %26 {strides = array<i32>} : memref<8x32xf32, #tpu.memory_space<vmem>>, vector<1x32xf32>,
    %c2_i32 = arith.constant 2 : i32
    %29 = arith.addi %0, %c2_i32 : i32
    %30 = arith.index_cast %29 : i32 to index
    %31 = memref.load %arg1[%30] : memref<16xi32, #tpu.memory_space<smem>>
    %32 = arith.addi %0, %c2_i32 : i32
    %33 = arith.index_cast %32 : i32 to index
    %34 = memref.load %arg2[%33] : memref<16xi32, #tpu.memory_space<smem>>
    %35 = arith.index_cast %31 : i32 to index
    %c0_7 = arith.constant 0 : index
    %36 = vector.load %arg3[%35, %c0_7] : memref<16x32xf32, #tpu.memory_space<vmem>>, vector<1x32xf32>
    %37 = arith.index_cast %c2_i32 : i32 to index
    %c0_8 = arith.constant 0 : index
    %38 = vector.load %arg8[%37, %c0_8] : memref<8x32xf32, #tpu.memory_space<vmem>>, vector<1x32xf32>
    tpu.vector_store %arg8[%37, %c0_8], %36 {strides = array<i32>} : memref<8x32xf32, #tpu.memory_space<vmem>>, vector<1x32xf32>,
    %39 = arith.index_cast %34 : i32 to index
    %c0_9 = arith.constant 0 : index
    %40 = vector.load %arg4[%39, %c0_9] : memref<16x32xf32, #tpu.memory_space<vmem>>, vector<1x32xf32>
    %41 = arith.index_cast %c2_i32 : i32 to index
    %c0_10 = arith.constant 0 : index
    %42 = vector.load %arg9[%41, %c0_10] : memref<8x32xf32, #tpu.memory_space<vmem>>, vector<1x32xf32>
    tpu.vector_store %arg9[%41, %c0_10], %40 {strides = array<i32>} : memref<8x32xf32, #tpu.memory_space<vmem>>, vector<1x32xf32>,
    %c3_i32 = arith.constant 3 : i32
    %43 = arith.addi %0, %c3_i32 : i32
    %44 = arith.index_cast %43 : i32 to index
    %45 = memref.load %arg1[%44] : memref<16xi32, #tpu.memory_space<smem>>
    %46 = arith.addi %0, %c3_i32 : i32
    %47 = arith.index_cast %46 : i32 to index
    %48 = memref.load %arg2[%47] : memref<16xi32, #tpu.memory_space<smem>>
    %49 = arith.index_cast %45 : i32 to index
    %c0_11 = arith.constant 0 : index
    %50 = vector.load %arg3[%49, %c0_11] : memref<16x32xf32, #tpu.memory_space<vmem>>, vector<1x32xf32>
    %51 = arith.index_cast %c3_i32 : i32 to index
    %c0_12 = arith.constant 0 : index
    %52 = vector.load %arg8[%51, %c0_12] : memref<8x32xf32, #tpu.memory_space<vmem>>, vector<1x32xf32>
    tpu.vector_store %arg8[%51, %c0_12], %50 {strides = array<i32>} : memref<8x32xf32, #tpu.memory_space<vmem>>, vector<1x32xf32>,
    %53 = arith.index_cast %48 : i32 to index
    %c0_13 = arith.constant 0 : index
    %54 = vector.load %arg4[%53, %c0_13] : memref<16x32xf32, #tpu.memory_space<vmem>>, vector<1x32xf32>
    %55 = arith.index_cast %c3_i32 : i32 to index
    %c0_14 = arith.constant 0 : index
    %56 = vector.load %arg9[%55, %c0_14] : memref<8x32xf32, #tpu.memory_space<vmem>>, vector<1x32xf32>
    tpu.vector_store %arg9[%55, %c0_14], %54 {strides = array<i32>} : memref<8x32xf32, #tpu.memory_space<vmem>>, vector<1x32xf32>,
    %c4_i32 = arith.constant 4 : i32
    %57 = arith.addi %0, %c4_i32 : i32
    %58 = arith.index_cast %57 : i32 to index
    %59 = memref.load %arg1[%58] : memref<16xi32, #tpu.memory_space<smem>>
    %60 = arith.addi %0, %c4_i32 : i32
    %61 = arith.index_cast %60 : i32 to index
    %62 = memref.load %arg2[%61] : memref<16xi32, #tpu.memory_space<smem>>
    %63 = arith.index_cast %59 : i32 to index
    %c0_15 = arith.constant 0 : index
    %64 = vector.load %arg3[%63, %c0_15] : memref<16x32xf32, #tpu.memory_space<vmem>>, vector<1x32xf32>
    %65 = arith.index_cast %c4_i32 : i32 to index
    %c0_16 = arith.constant 0 : index
    %66 = vector.load %arg8[%65, %c0_16] : memref<8x32xf32, #tpu.memory_space<vmem>>, vector<1x32xf32>
    tpu.vector_store %arg8[%65, %c0_16], %64 {strides = array<i32>} : memref<8x32xf32, #tpu.memory_space<vmem>>, vector<1x32xf32>,
    %67 = arith.index_cast %62 : i32 to index
    %c0_17 = arith.constant 0 : index
    %68 = vector.load %arg4[%67, %c0_17] : memref<16x32xf32, #tpu.memory_space<vmem>>, vector<1x32xf32>
    %69 = arith.index_cast %c4_i32 : i32 to index
    %c0_18 = arith.constant 0 : index
    %70 = vector.load %arg9[%69, %c0_18] : memref<8x32xf32, #tpu.memory_space<vmem>>, vector<1x32xf32>
    tpu.vector_store %arg9[%69, %c0_18], %68 {strides = array<i32>} : memref<8x32xf32, #tpu.memory_space<vmem>>, vector<1x32xf32>,
    %c5_i32 = arith.constant 5 : i32
    %71 = arith.addi %0, %c5_i32 : i32
    %72 = arith.index_cast %71 : i32 to index
    %73 = memref.load %arg1[%72] : memref<16xi32, #tpu.memory_space<smem>>
    %74 = arith.addi %0, %c5_i32 : i32
    %75 = arith.index_cast %74 : i32 to index
    %76 = memref.load %arg2[%75] : memref<16xi32, #tpu.memory_space<smem>>
    %77 = arith.index_cast %73 : i32 to index
    %c0_19 = arith.constant 0 : index
    %78 = vector.load %arg3[%77, %c0_19] : memref<16x32xf32, #tpu.memory_space<vmem>>, vector<1x32xf32>
    %79 = arith.index_cast %c5_i32 : i32 to index
    %c0_20 = arith.constant 0 : index
    %80 = vector.load %arg8[%79, %c0_20] : memref<8x32xf32, #tpu.memory_space<vmem>>, vector<1x32xf32>
    tpu.vector_store %arg8[%79, %c0_20], %78 {strides = array<i32>} : memref<8x32xf32, #tpu.memory_space<vmem>>, vector<1x32xf32>,
    %81 = arith.index_cast %76 : i32 to index
    %c0_21 = arith.constant 0 : index
    %82 = vector.load %arg4[%81, %c0_21] : memref<16x32xf32, #tpu.memory_space<vmem>>, vector<1x32xf32>
    %83 = arith.index_cast %c5_i32 : i32 to index
    %c0_22 = arith.constant 0 : index
    %84 = vector.load %arg9[%83, %c0_22] : memref<8x32xf32, #tpu.memory_space<vmem>>, vector<1x32xf32>
    tpu.vector_store %arg9[%83, %c0_22], %82 {strides = array<i32>} : memref<8x32xf32, #tpu.memory_space<vmem>>, vector<1x32xf32>,
    %c6_i32 = arith.constant 6 : i32
    %85 = arith.addi %0, %c6_i32 : i32
    %86 = arith.index_cast %85 : i32 to index
    %87 = memref.load %arg1[%86] : memref<16xi32, #tpu.memory_space<smem>>
    %88 = arith.addi %0, %c6_i32 : i32
    %89 = arith.index_cast %88 : i32 to index
    %90 = memref.load %arg2[%89] : memref<16xi32, #tpu.memory_space<smem>>
    %91 = arith.index_cast %87 : i32 to index
    %c0_23 = arith.constant 0 : index
    %92 = vector.load %arg3[%91, %c0_23] : memref<16x32xf32, #tpu.memory_space<vmem>>, vector<1x32xf32>
    %93 = arith.index_cast %c6_i32 : i32 to index
    %c0_24 = arith.constant 0 : index
    %94 = vector.load %arg8[%93, %c0_24] : memref<8x32xf32, #tpu.memory_space<vmem>>, vector<1x32xf32>
    tpu.vector_store %arg8[%93, %c0_24], %92 {strides = array<i32>} : memref<8x32xf32, #tpu.memory_space<vmem>>, vector<1x32xf32>,
    %95 = arith.index_cast %90 : i32 to index
    %c0_25 = arith.constant 0 : index
    %96 = vector.load %arg4[%95, %c0_25] : memref<16x32xf32, #tpu.memory_space<vmem>>, vector<1x32xf32>
    %97 = arith.index_cast %c6_i32 : i32 to index
    %c0_26 = arith.constant 0 : index
    %98 = vector.load %arg9[%97, %c0_26] : memref<8x32xf32, #tpu.memory_space<vmem>>, vector<1x32xf32>
    tpu.vector_store %arg9[%97, %c0_26], %96 {strides = array<i32>} : memref<8x32xf32, #tpu.memory_space<vmem>>, vector<1x32xf32>,
    %c7_i32 = arith.constant 7 : i32
    %99 = arith.addi %0, %c7_i32 : i32
    %100 = arith.index_cast %99 : i32 to index
    %101 = memref.load %arg1[%100] : memref<16xi32, #tpu.memory_space<smem>>
    %102 = arith.addi %0, %c7_i32 : i32
    %103 = arith.index_cast %102 : i32 to index
    %104 = memref.load %arg2[%103] : memref<16xi32, #tpu.memory_space<smem>>
    %105 = arith.index_cast %101 : i32 to index
    %c0_27 = arith.constant 0 : index
    %106 = vector.load %arg3[%105, %c0_27] : memref<16x32xf32, #tpu.memory_space<vmem>>, vector<1x32xf32>
    %107 = arith.index_cast %c7_i32 : i32 to index
    %c0_28 = arith.constant 0 : index
    %108 = vector.load %arg8[%107, %c0_28] : memref<8x32xf32, #tpu.memory_space<vmem>>, vector<1x32xf32>
    tpu.vector_store %arg8[%107, %c0_28], %106 {strides = array<i32>} : memref<8x32xf32, #tpu.memory_space<vmem>>, vector<1x32xf32>,
    %109 = arith.index_cast %104 : i32 to index
    %c0_29 = arith.constant 0 : index
    %110 = vector.load %arg4[%109, %c0_29] : memref<16x32xf32, #tpu.memory_space<vmem>>, vector<1x32xf32>
    %111 = arith.index_cast %c7_i32 : i32 to index
    %c0_30 = arith.constant 0 : index
    %112 = vector.load %arg9[%111, %c0_30] : memref<8x32xf32, #tpu.memory_space<vmem>>, vector<1x32xf32>
    tpu.vector_store %arg9[%111, %c0_30], %110 {strides = array<i32>} : memref<8x32xf32, #tpu.memory_space<vmem>>, vector<1x32xf32>,
    %c8_i32_31 = arith.constant 8 : i32
    %c0_32 = arith.constant 0 : index
    %c0_33 = arith.constant 0 : index
    %113 = vector.load %arg8[%c0_32, %c0_33] : memref<8x32xf32, #tpu.memory_space<vmem>>, vector<8x32xf32>
    %c0_34 = arith.constant 0 : index
    %c0_35 = arith.constant 0 : index
    %114 = vector.load %arg9[%c0_34, %c0_35] : memref<8x32xf32, #tpu.memory_space<vmem>>, vector<8x32xf32>
    %c0_36 = arith.constant 0 : index
    %c0_37 = arith.constant 0 : index
    %115 = vector.load %arg5[%c0_36, %c0_37] : memref<1x32xf32, #tpu.memory_space<vmem>>, vector<1x32xf32>
    %116 = arith.mulf %113, %114 : vector<8x32xf32>
    %117 = vector.broadcast %115 : vector<1x32xf32> to vector<8x32xf32>
    %118 = arith.mulf %116, %117 : vector<8x32xf32>
    %cst = arith.constant dense<0.000000e+00> : vector<8xf32>
    %119 = vector.multi_reduction <add>, %118, %cst [1] : vector<8x32xf32> to vector<8xf32>
    %120 = vector.shape_cast %119 : vector<8xf32> to vector<8x1xf32>
    %c0_38 = arith.constant 0 : index
    %121 = memref.load %arg6[%c0_38] : memref<1xf32, #tpu.memory_space<smem>>
    %122 = vector.broadcast %121 : f32 to vector<8x1xf32>
    %123 = arith.addf %120, %122 : vector<8x1xf32>
    %cst_39 = arith.constant 0.000000e+00 : f32
    %124 = vector.broadcast %cst_39 : f32 to vector<8x1xf32>
    %125 = arith.subf %124, %123 : vector<8x1xf32>
    %126 = math.exp %125 : vector<8x1xf32>
    %cst_40 = arith.constant 1.000000e+00 : f32
    %127 = vector.broadcast %cst_40 : f32 to vector<8x1xf32>
    %128 = arith.addf %127, %126 : vector<8x1xf32>
    %cst_41 = arith.constant 1.000000e+00 : f32
    %129 = vector.broadcast %cst_41 : f32 to vector<8x1xf32>
    %130 = arith.divf %129, %128 : vector<8x1xf32>
    %c0_42 = arith.constant 0 : index
    %c0_43 = arith.constant 0 : index
    %131 = vector.load %arg7[%c0_42, %c0_43] : memref<8x1xf32, #tpu.memory_space<vmem>>, vector<8x1xf32>
    tpu.vector_store %arg7[%c0_42, %c0_43], %130 {strides = array<i32>} : memref<8x1xf32, #tpu.memory_space<vmem>>, vector<8x1xf32>,
    return
  }
  func.func @transform_0(%arg0: i32, %arg1: memref<16xi32, #tpu.memory_space<smem>>, %arg2: memref<16xi32, #tpu.memory_space<smem>>) -> (i32, i32) {
    %c0_i32 = arith.constant 0 : i32
    %c0_i32_0 = arith.constant 0 : i32
    %c0_i32_1 = arith.constant 0 : i32
    return %c0_i32, %c0_i32_0 : i32, i32
  }
  func.func @transform_1(%arg0: i32, %arg1: memref<16xi32, #tpu.memory_space<smem>>, %arg2: memref<16xi32, #tpu.memory_space<smem>>) -> (i32, i32) {
    %c0_i32 = arith.constant 0 : i32
    %c0_i32_0 = arith.constant 0 : i32
    %c0_i32_1 = arith.constant 0 : i32
    return %c0_i32, %c0_i32_0 : i32, i32
  }
  func.func @transform_2(%arg0: i32, %arg1: memref<16xi32, #tpu.memory_space<smem>>, %arg2: memref<16xi32, #tpu.memory_space<smem>>) -> (i32, i32) {
    %c0_i32 = arith.constant 0 : i32
    %c0_i32_0 = arith.constant 0 : i32
    %c0_i32_1 = arith.constant 0 : i32
    return %c0_i32, %c0_i32_0 : i32, i32
  }
  func.func @transform_3(%arg0: i32, %arg1: memref<16xi32, #tpu.memory_space<smem>>, %arg2: memref<16xi32, #tpu.memory_space<smem>>) -> i32 {
    %c0_i32 = arith.constant 0 : i32
    %c0_i32_0 = arith.constant 0 : i32
    return %c0_i32 : i32
  }
  func.func @transform_4(%arg0: i32, %arg1: memref<16xi32, #tpu.memory_space<smem>>, %arg2: memref<16xi32, #tpu.memory_space<smem>>) -> (i32, i32) {
    %c0_i32 = arith.constant 0 : i32
    %c0_i32_0 = arith.constant 0 : i32
    return %arg0, %c0_i32 : i32, i32
  }
}

</mosaic_0001>

<bundles_post_ra>
// kernel: gmf_forward.1
= control target key start
LH: loop header
LB: loop body
LE: loop exit
PB: predicated region body
PF: predicated region fallthrough
CT: control target
= control target key end

     0   :  { %s681_s0 = inlined_call_operand.vmem [shape: s32[16], index: 0, kind: input, shape index: {}]   ;;  %s682_s2 = inlined_call_operand.hbm [shape: f32[16,32], index: 2, kind: input, shape index: {}]   ;;  %s683_s3 = inlined_call_operand.hbm [shape: f32[16,32], index: 3, kind: input, shape index: {}]   ;;  %s684_s4 = inlined_call_operand.vmem [shape: f32[1,32], index: 4, kind: input, shape index: {}]   ;;  %s685_s6 = inlined_call_operand.vmem [shape: f32[16,1], index: 6, kind: output, shape index: {}]   ;;  %s686_s1 = inlined_call_operand.vmem [shape: s32[16], index: 1, kind: input, shape index: {}]   ;;  %s687_s5 = inlined_call_operand.<no memory space> [shape: f32[1], index: 5, kind: input, shape index: {}]  }
   0x1   :  { %s11_s23 = sshll.u32 %s681_s0, 4  ;;  %s15_s26 = sshll.u32 %s686_s1, 4  ;;  %s12_s23 = int_to_ptr.vmem [resolvable:$true] %s11_s23  ;;  %s16_s26 = int_to_ptr.vmem [resolvable:$true] %s15_s26 }
   0x2   :  { %s447_s27 = scalar_lea.vmem %s12_s23, 16  ;;  %p452_p1 = scmp.lt.s32.totalorder %s12_s23, %s12_s23 }
   0x3   :  { %p448_p0 = scmp.ne.s32.totalorder %s12_s23, %s447_s27  ;;  %p453_p2 = scmp.lt.s32.totalorder %s447_s27, %s447_s27 }
   0x5   :  { %p454_p3 = por %p453_p2, %p452_p1 }
   0x7   :  { %p455_p4 = pnand %p454_p3, %p448_p0 }
   0x9   :  { %458 = shalt.err (!%p455_p4)  }
   0xa   :  { %s541_s28 = smov [#allocation5]   ;;  %s459_s29 = scalar_lea.vmem %s16_s26, 16 }
   0xb   :  { %14 = dma.vmem_to_smem %s12_s23, 16, %s541_s28, [#allocation4] }
   0xc   :  { %p460_p5 = scmp.ne.s32.totalorder %s16_s26, %s459_s29  ;;  %p464_p6 = scmp.lt.s32.totalorder %s16_s26, %s16_s26 }
   0xd   :  { %p465_p7 = scmp.lt.s32.totalorder %s459_s29, %s459_s29 }
   0xf   :  { %p466_p8 = por %p465_p7, %p464_p6 }
  0x11   :  { %p467_p9 = pnand %p466_p8, %p460_p5 }
  0x13   :  { %470 = shalt.err (!%p467_p9)  }
  0x14   :  { %s542_s0 = smov [#allocation6]   ;;  %19 = sst [smem:[#allocation7]] %s687_s5 }
  0x15   :  { %18 = dma.vmem_to_smem %s16_s26, 16, %s542_s0, [#allocation4] }
  0x16   :  { %527 = dma.done.wait [#allocation4], 32 }
  0x17   :  { %528 = vsyncadd [#allocation4], 4294967264 }
  0x18   :  { %21 = sfence }
  0x19   :  { %22 = vsyncpa [#allocation9], 0 }
  0x1a   :  { %23 = vsyncpa [#allocation11], 0  ;;  %s591_s7 = smov 0  }
  0x1b LB: > { %s597_s8 = sadd.s32 4294967295, %s539_s7   ;;  %p399_p10 = scmp.ge.s32.totalorder %s539_s7, 1  ;;  %s539_s7 = sphi %s591_s7, %s29_s7  }
  0x1c   : > { %p144_p11 = scmp.lt.s32.totalorder %s539_s7, 3  ;;  %s543_s5 = smov [#allocation8]  }
  0x1d   : > { %s156_s9 = sshll.u32 %s543_s5, 4  ;;  %p425_p13 = scmp.eq.s32.totalorder %s597_s8, 0  ;;  %s157_s9 = int_to_ptr.vmem [resolvable:$true] %s156_s9 }
  0x1e   : > { %p601_p12 = pnand %p399_p10, %p144_p11  ;;  %s544_s11 = smov [#allocation10]  }
  0x1f   : > { %s169_s12 = sshll.u32 %s544_s11, 4  ;;  %s482_s14 = scalar_lea.vmem %s157_s9, 256  ;;  %s170_s12 = int_to_ptr.vmem [resolvable:$true] %s169_s12 }
  0x20   : > { %p418_p0 = pneg %p601_p12  ;;  %p483_p3 = scmp.ne.s32.totalorder %s157_s9, %s482_s14 }
  0x21   : > { %p490_p6 = scmp.lt.s32.totalorder %s157_s9, %s157_s9  ;;  %p491_p7 = scmp.lt.s32.totalorder %s482_s14, %s482_s14 }
  0x22   : > { %p610_p1 = pnand %p425_p13, %p418_p0 }
  0x23   : > { %p492_p8 = por %p491_p7, %p490_p6 }
  0x24   : > { %p473_p2 = pneg %p610_p1 }
  0x26   : > { %p485_p4 = pnand %p483_p3, %p473_p2 }
  0x28   : > { %p486_p5 = pneg %p485_p4 }
  0x2a   : > { %p493_p9 = pnand %p492_p8, %p486_p5 }
  0x2c   : > { %496 = shalt.err (!%p493_p9)
}
  0x2d   : > { %s545_s15 = smov 128   ;;  %s546_s16 = smov 8  }
  0x2e   : > { %421 = dma.hbm_to_vmem [thread:$0]  (!%p610_p1), %s682_s2, 256, %s157_s9, [#allocation9], %s545_s15, %s545_s15, %s546_s16  }
  0x2f   : > { %s508_s19 = scalar_lea.vmem %s170_s12, 256  ;;  %p516_p3 = scmp.lt.s32.totalorder %s170_s12, %s170_s12 }
  0x30   : > { %p509_p10 = scmp.ne.s32.totalorder %s170_s12, %s508_s19  ;;  %p517_p4 = scmp.lt.s32.totalorder %s508_s19, %s508_s19 }
  0x32   : > { %p511_p11 = pnand %p509_p10, %p473_p2  ;;  %p518_p6 = por %p517_p4, %p516_p3 }
  0x34   : > { %p512_p0 = pneg %p511_p11 }
  0x36   : > { %p519_p5 = pnand %p518_p6, %p512_p0 }
  0x38   : > { %522 = shalt.err (!%p519_p5)
}
  0x39   : > { %424 = dma.hbm_to_vmem [thread:$0]  (!%p610_p1), %s683_s3, 256, %s170_s12, [#allocation11], %s545_s15, %s545_s15, %s546_s16  }
  0x3a   : > { %191 = sbr.rel (%p601_p12) target bundleno = 279 (0x117), region = 36 }
  0x3f   : > { %530 = dma.done.wait (%p425_p13), [#allocation9], 256  }
  0x40   : > { %532 = vsyncadd (%p425_p13), [#allocation9], 4294967040 }
  0x41   : > { %534 = dma.done.wait (%p425_p13), [#allocation11], 256  }
  0x42   : > { %536 = vsyncadd (%p425_p13), [#allocation11], 4294967040  ;;  %s643_s22 = sshll.u32 %s597_s8, 3  ;;  %vm224_vm0 = vcmask 253952   ;;  %v407_v18 = vld [vmem:[%s684_s4] ss:$0 sm:$0xff] }
  0x43   : > { %s220_s23 = sld [smem:[#allocation5 + %s643_s22]]  ;;  %s229_s24 = sadd.s32 1, %s643_s22  ;;  %vm303_vm1 = vcmask 261120   ;;  %vm316_vm2 = vcmask 7168  }
  0x44   : > { %s221_s25 = sld [smem:[#allocation6 + %s643_s22]]  ;;  %s238_s26 = sadd.s32 2, %s643_s22 }
  0x45   : > { %s230_s27 = sld [smem:[#allocation5 + %s229_s24]]  ;;  %s247_s28 = sadd.s32 3, %s643_s22 }
  0x46   : > { %s231_s29 = sld [smem:[#allocation6 + %s229_s24]]  ;;  %s256_s0 = sadd.s32 4, %s643_s22 }
  0x47   : > { %s239_s1 = sld [smem:[#allocation5 + %s238_s26]]  ;;  %s265_s30 = sadd.s32 5, %s643_s22 }
  0x48   : > { %s240_s5 = sld [smem:[#allocation6 + %s238_s26]]  ;;  %s274_s9 = sadd.s32 6, %s643_s22 }
  0x49   : > { %s248_s10 = sld [smem:[#allocation5 + %s247_s28]]  ;;  %s222_s11 = scalar_lea.vmem [#allocation8], %s220_s23 }
  0x4a   : > { %v223_v0 = vld [vmem:[%s222_s11] sm:$0x1]  ;;  %s249_s12 = sld [smem:[#allocation6 + %s247_s28]]  ;;  %s226_s13 = scalar_lea.vmem [#allocation10], %s221_s25 }
  0x4b   : > { %225 = vst.msk [vmem:[#allocation2] sm:$0x1] %vm224_vm0, %v223_v0  ;;  %v227_v1 = vld [vmem:[%s226_s13] sm:$0x1]  ;;  %s257_s14 = sld [smem:[#allocation5 + %s256_s0]]  ;;  %s232_s15 = scalar_lea.vmem [#allocation8], %s230_s27 }
  0x4c   : > { %228 = vst.msk [vmem:[#allocation3] sm:$0x1] %vm224_vm0, %v227_v1  ;;  %v233_v2 = vld [vmem:[%s232_s15] sm:$0x1]  ;;  %s258_s16 = sld [smem:[#allocation6 + %s256_s0]]  ;;  %s235_s17 = scalar_lea.vmem [#allocation10], %s231_s29 }
  0x4d   : > { %234 = vst.msk [vmem:[#allocation2 + $0x1] sm:$0x1] %vm224_vm0, %v233_v2  ;;  %v236_v3 = vld [vmem:[%s235_s17] sm:$0x1]  ;;  %s266_s18 = sld [smem:[#allocation5 + %s265_s30]]  ;;  %s241_s19 = scalar_lea.vmem [#allocation8], %s239_s1 }
  0x4e   : > { %237 = vst.msk [vmem:[#allocation3 + $0x1] sm:$0x1] %vm224_vm0, %v236_v3  ;;  %v242_v4 = vld [vmem:[%s241_s19] sm:$0x1]  ;;  %s267_s20 = sld [smem:[#allocation6 + %s265_s30]]  ;;  %s244_s21 = scalar_lea.vmem [#allocation10], %s240_s5 }
  0x4f   : > { %243 = vst.msk [vmem:[#allocation2 + $0x2] sm:$0x1] %vm224_vm0, %v242_v4  ;;  %v245_v5 = vld [vmem:[%s244_s21] sm:$0x1]  ;;  %s275_s23 = sld [smem:[#allocation5 + %s274_s9]]  ;;  %s250_s24 = scalar_lea.vmem [#allocation8], %s248_s10 }
  0x50   : > { %246 = vst.msk [vmem:[#allocation3 + $0x2] sm:$0x1] %vm224_vm0, %v245_v5  ;;  %v251_v6 = vld [vmem:[%s250_s24] sm:$0x1]  ;;  %s276_s25 = sld [smem:[#allocation6 + %s274_s9]]  ;;  %s253_s26 = scalar_lea.vmem [#allocation10], %s249_s12 }
  0x51   : > { %252 = vst.msk [vmem:[#allocation2 + $0x3] sm:$0x1] %vm224_vm0, %v251_v6  ;;  %v254_v7 = vld [vmem:[%s253_s26] sm:$0x1]  ;;  %s283_s27 = sadd.s32 7, %s643_s22  ;;  %s259_s28 = scalar_lea.vmem [#allocation8], %s257_s14 }
  0x52   : > { %255 = vst.msk [vmem:[#allocation3 + $0x3] sm:$0x1] %vm224_vm0, %v254_v7  ;;  %v260_v8 = vld [vmem:[%s259_s28] sm:$0x1]  ;;  %s284_s29 = sld [smem:[#allocation5 + %s283_s27]]  ;;  %s262_s0 = scalar_lea.vmem [#allocation10], %s258_s16 }
  0x53   : > { %261 = vst.msk [vmem:[#allocation2 + $0x4] sm:$0x1] %vm224_vm0, %v260_v8  ;;  %v263_v9 = vld [vmem:[%s262_s0] sm:$0x1]  ;;  %s285_s1 = sld [smem:[#allocation6 + %s283_s27]]  ;;  %s268_s30 = scalar_lea.vmem [#allocation8], %s266_s18 }
  0x54   : > { %264 = vst.msk [vmem:[#allocation3 + $0x4] sm:$0x1] %vm224_vm0, %v263_v9  ;;  %v269_v10 = vld [vmem:[%s268_s30] sm:$0x1]  ;;  %s271_s5 = scalar_lea.vmem [#allocation10], %s267_s20  ;;  %s307_s14 = sld [smem:[#allocation7]] }
  0x55   : > { %270 = vst.msk [vmem:[#allocation2 + $0x5] sm:$0x1] %vm224_vm0, %v269_v10  ;;  %v272_v11 = vld [vmem:[%s271_s5] sm:$0x1]  ;;  %s277_s22 = scalar_lea.vmem [#allocation8], %s275_s23  ;;  %p215_p12 = scmp.lt.s32.totalorder %s597_s8, 1 }
  0x56   : > { %273 = vst.msk [vmem:[#allocation3 + $0x5] sm:$0x1] %vm224_vm0, %v272_v11  ;;  %v278_v12 = vld [vmem:[%s277_s22] sm:$0x1]  ;;  %s280_s9 = scalar_lea.vmem [#allocation10], %s276_s25 }
  0x57   : > { %279 = vst.msk [vmem:[#allocation2 + $0x6] sm:$0x1] %vm224_vm0, %v278_v12  ;;  %v281_v13 = vld [vmem:[%s280_s9] sm:$0x1]  ;;  %s691_s8 = smov (!%p215_p12, %s597_s8), 1 }
  0x58   : > { %282 = vst.msk [vmem:[#allocation3 + $0x6] sm:$0x1] %vm224_vm0, %v281_v13  ;;  %s286_s10 = scalar_lea.vmem [#allocation8], %s284_s29  ;;  %s405_s15 = sshll.u32 %s691_s8, 3 }
  0x59   : > { %v287_v14 = vld [vmem:[%s286_s10] sm:$0x1]  ;;  %s289_s11 = scalar_lea.vmem [#allocation10], %s285_s1  ;;  %s218_s18 = scalar_lea.vmem %s685_s6, %s405_s15 }
  0x5a   : > { %288 = vst.msk [vmem:[#allocation2 + $0x7] sm:$0x1] %vm224_vm0, %v287_v14  ;;  %v290_v15 = vld [vmem:[%s289_s11] sm:$0x1]  ;;  %v308_v22 = vstv %s307_s14 }
  0x5b   : > { %291 = vst.msk [vmem:[#allocation3 + $0x7] sm:$0x1] %vm224_vm0, %v290_v15 }
  0x61   : > { %v292_v16 = vld [vmem:[#allocation2] sm:$0xff] }
  0x62   : > { %v293_v17 = vld [vmem:[#allocation3] sm:$0xff] }
  0x63   : > { %v295_v19 = vmul.f32 %v293_v17, %v292_v16 }
  0x65   : > { %v302_v20 = vmul.f32 %v407_v18, %v295_v19 }
  0x67   : > { %v304_v21 = vsel %vm303_vm1, %v302_v20, 0.0 }
  0x68   : > { %305 = vadd.xlane.f32.xlu0 %v304_v21 }
  0xf1   : > { %v306_v23 = vpop.xlane.xlu0 %305 }
  0xf2   : > { %v309_v24 = vadd.f32 %v308_v22, %v306_v23 }
  0xf4   : > { %v310_v25 = vsub.f32 0.0, %v309_v24 }
  0xf6   : > { %v311_v26 = vmul.f32 1.442695, %v310_v25 }
  0xf8   : > { %443 = vpow2.f32 %v311_v26 }
 0x105   : > { %v444_v27 = vpop.eup %443 }
 0x106   : > { %v313_v28 = vadd.f32 1.0, %v444_v27 }
 0x108   : > { %445 = vrcp.f32 %v313_v28 }
 0x115   : > { %v446_v29 = vpop.eup %445 }
 0x116   : > { %317 = vst.msk [vmem:[%s218_s18] sm:$0xff] %vm316_vm2, %v446_v29 }
 0x117 PF: > { %s29_s7 = sadd.s32 1, %s539_s7  }
 0x118   : > { %p26_p13 = scmp.ge.s32.totalorder %s29_s7, 4  }
 0x11a   :  { %28 = sbr.rel (!%p26_p13) target bundleno = 27 (0x1b), region = 88 }
 0x11f   :  { %337 = vsyncpa [#allocation9], 1 }
 0x120   :  { %339 = vsyncpa [#allocation9 + $0x1], 1 }
 0x121   :  { %340 = vsyncpa [#allocation11], 1 }

</bundles_post_ra>
